<compile_context>
chip_gen: v7x
topology: tpu7x:2x2x1
jax: 0.10.0
libtpu: 0.0.40
codegen_flags: <defaults>
</compile_context>

<pallas_src>
import numpy as np
import jax
import jax.numpy as jnp
from jax.experimental import pallas as pl
from jax.experimental.pallas import tpu as pltpu


def _round_up(n, m):
    return (n + m - 1) // m * m


# ----------------------------------------------------------------------------
# NMS (faithful port of the reference; np.int -> np.int64 for modern NumPy)
# ----------------------------------------------------------------------------
def nms(scores_np, proposalN, iou_threshs, coordinates, IND=None):
    if not (type(scores_np).__module__ == 'numpy' and len(scores_np.shape) == 2
            and (scores_np.shape[1] == 1)):
        raise TypeError('score_np is not right')
    windows_num = scores_np.shape[0]
    if windows_num == 0:
        raise ValueError('nms received an empty score segment')
    indices_coordinates = np.concatenate((scores_np, coordinates), 1)
    if IND is not None:
        indices = IND
    else:
        indices = np.argsort(indices_coordinates[:, 0])
    indices_coordinates = np.concatenate(
        (indices_coordinates, np.arange(0, windows_num).reshape(windows_num, 1)), 1)[indices]
    indices_results = []
    res = indices_coordinates
    while res.any():
        indice_coordinates = res[-1]
        indices_results.append(indice_coordinates[5])
        if len(indices_results) == proposalN:
            return np.array(indices_results).reshape(1, proposalN).astype(np.int64)
        res = res[:-1]
        start_max = np.maximum(res[:, 1:3], indice_coordinates[1:3])
        end_min = np.minimum(res[:, 3:5], indice_coordinates[3:5])
        lengths = end_min - start_max + 1
        intersec_map = lengths[:, 0] * lengths[:, 1]
        intersec_map[np.logical_or(lengths[:, 0] < 0, lengths[:, 1] < 0)] = 0
        iou_map_cur = intersec_map / (
            (res[:, 3] - res[:, 1] + 1) * (res[:, 4] - res[:, 2] + 1)
            + (indice_coordinates[3] - indice_coordinates[1] + 1)
            * (indice_coordinates[4] - indice_coordinates[2] + 1) - intersec_map)
        res = res[iou_map_cur <= iou_threshs]
    # NOTE: inherited from the reference — assumes at least one pick was made.
    while len(indices_results) != proposalN:
        indices_results.append(indice_coordinates[5])
    return np.array(indices_results).reshape(1, -1).astype(np.int64)


# ----------------------------------------------------------------------------
# Per-channel window-membership matrix (compile-time constant)
# ----------------------------------------------------------------------------
def _window_matrix_hw(H, W, ratios, stride):
    """P[h*W+w, col] = 1 iff pixel (h,w) lies in window `col` (columns ordered
    (ratio, oh, ow)), plus a per-column f32 averaging scale 1/(kh*kw).

    0/1 membership is exact in bf16; the scale is kept separate and applied in f32
    inside the kernel.  Both axes zero-padded to multiples of 128 (lane-dense).
    """
    counts = []
    for (kh, kw) in ratios:
        OH = (H - kh) // stride + 1
        OW = (W - kw) // stride + 1
        counts.append(OH * OW)
    N = sum(counts)
    K = H * W
    K_pad = _round_up(K, 128)
    N_pad = _round_up(N, 128)

    P = np.zeros((K_pad, N_pad), np.float32)
    scale = np.zeros((1, N_pad), np.float32)
    col = 0
    for (kh, kw) in ratios:
        OH = (H - kh) // stride + 1
        OW = (W - kw) // stride + 1
        s = 1.0 / float(kh * kw)
        for oh in range(OH):
            for ow in range(OW):
                y0, x0 = oh * stride, ow * stride
                for h in range(y0, y0 + kh):
                    row0 = h * W + x0
                    P[row0: row0 + kw, col] = 1.0
                scale[0, col] = s
                col += 1
    return P, scale, N, counts


# ----------------------------------------------------------------------------
# Pallas kernel: one bf16 MXU matmul does every pooling window; f32 post-scale on VPU
# ----------------------------------------------------------------------------
def _pool_kernel(x_ref, p_ref, s_ref, o_ref):
    acc = jnp.dot(x_ref[...], p_ref[...], preferred_element_type=jnp.float32)
    o_ref[...] = acc * s_ref[...]          # (TM, N_pad) * (1, N_pad) broadcast, f32


def appm_pool_scores(x_bchw, ratios, stride):
    """All AvgPool2d(ratios[i], stride) windows of x (NCHW) in one Pallas call.

    Channels are folded into the matmul M dimension (the full window matrix is
    block-diagonal over channels), so X is (B*C, H*W) and P is the per-channel
    (H*W, sum_r OH_r*OW_r) membership matrix.  The (ratio, c, oh, ow) column order
    of torch.cat([avgpool_i(x).view(B,-1,1)], dim=1) is restored in the wrapper.

    Returns window_scores of shape (B, total_windows), f32.
    """
    B, C, H, W = x_bchw.shape
    P_np, scale_np, N_hw, counts = _window_matrix_hw(H, W, ratios, stride)
    K_pad, N_pad = P_np.shape
    K = H * W

    M = B * C
    M_pad8 = _round_up(M, 8)
    TM = 128 if M_pad8 >= 128 else M_pad8        # 128-row tiles once there is real work
    M_pad = _round_up(M, TM)

    x2 = jnp.asarray(x_bchw, jnp.bfloat16).reshape(M, K)
    x2 = jnp.pad(x2, ((0, M_pad - M), (0, K_pad - K)))
    P = jnp.asarray(P_np, jnp.bfloat16)          # 0/1 -> exact in bf16
    scale = jnp.asarray(scale_np, jnp.float32)

    grid = (M_pad // TM,)
    flops = 2 * M_pad * K_pad * N_pad
    bytes_accessed = 2 * (M_pad * K_pad + K_pad * N_pad) + 4 * (M_pad * N_pad + N_pad)

    out = pl.pallas_call(
        _pool_kernel,
        out_shape=jax.ShapeDtypeStruct((M_pad, N_pad), jnp.float32),
        grid_spec=pltpu.PrefetchScalarGridSpec(
            num_scalar_prefetch=0,
            grid=grid,
            in_specs=[
                pl.BlockSpec((TM, K_pad), lambda i: (i, 0)),
                pl.BlockSpec((K_pad, N_pad), lambda i: (0, 0)),   # resident bf16 constant
                pl.BlockSpec((1, N_pad), lambda i: (0, 0)),       # resident f32 scale row
            ],
            out_specs=pl.BlockSpec((TM, N_pad), lambda i: (i, 0)),
        ),
        compiler_params=pltpu.CompilerParams(
            dimension_semantics=("parallel",)),                   # megacore split on v7x
        cost_estimate=pl.CostEstimate(
            flops=flops, transcendentals=0, bytes_accessed=bytes_accessed),
    )(x2, P, scale)

    # Layout plumbing (wrapper-side, not kernel compute):
    # (B*C, N_hw) -> (B, total) with (ratio, c, oh, ow) column order.
    out3 = out[:M, :N_hw].reshape(B, C, N_hw)
    segs = []
    lo = 0
    for n_r in counts:
        segs.append(out3[:, :, lo:lo + n_r].reshape(B, C * n_r))
        lo += n_r
    return jnp.concatenate(segs, axis=1)


# ----------------------------------------------------------------------------
# APPM forward (matches the PyTorch module's semantics)
# ----------------------------------------------------------------------------
def appm_forward(proposalN, x, ratios, stride, window_nums_sum, N_list,
                 iou_threshs, coordinates_cat):
    batch = x.shape[0]

    # AvgPool bank (the hot path) -> single Pallas matmul, already in all_scores order.
    window_scores = appm_pool_scores(x, ratios, stride)       # (B, total_windows)
    all_scores = window_scores[..., None]                      # (B, total_windows, 1)

    # Batched device-side argsort per ratio segment; only small int arrays + the score
    # slab cross to host.
    seg_bounds = []
    for j in range(len(window_nums_sum) - 1):
        lo = sum(window_nums_sum[:j + 1])
        hi = sum(window_nums_sum[:j + 2])
        seg_bounds.append((lo, hi))
    seg_orders = [np.asarray(jnp.argsort(window_scores[:, lo:hi], axis=1))
                  for (lo, hi) in seg_bounds]

    # TODO(synk): the NMS IoU suppression is a data-dependent sequential loop; the
    # original module also runs it on host NumPy after .data.cpu().numpy().
    windows_scores_np = np.asarray(all_scores)
    proposalN_indices = []
    for i in range(batch):
        indices_results = []
        for j, (lo, hi) in enumerate(seg_bounds):
            indices_results.append(
                nms(windows_scores_np[i, lo:hi], proposalN=N_list[j],
                    iou_threshs=iou_threshs[j],
                    coordinates=coordinates_cat[lo:hi],
                    IND=seg_orders[j][i]) + lo)
        proposalN_indices.append(np.concatenate(indices_results, 1))
    proposalN_indices = np.array(proposalN_indices).reshape(batch, proposalN)
    proposalN_indices = jnp.asarray(proposalN_indices, dtype=jnp.int32)

    # Batched gather (torch.index_select equivalent) — one op instead of B tiny ones.
    proposalN_windows_scores = jnp.take_along_axis(window_scores, proposalN_indices, axis=1)

    return proposalN_indices, proposalN_windows_scores, window_scores


# ----------------------------------------------------------------------------
# Demo / self-check
# ----------------------------------------------------------------------------
def _build_coordinates(C, ratios, stride, H, W):
    """One coordinate row per window, in the same (ratio, c, oh, ow) order as all_scores."""
    coords = []
    for (kh, kw) in ratios:
        OH = (H - kh) // stride + 1
        OW = (W - kw) // stride + 1
        for _c in range(C):
            for oh in range(OH):
                for ow in range(OW):
                    y0, x0 = oh * stride, ow * stride
                    coords.append([y0, x0, y0 + kh - 1, x0 + kw - 1])
    return np.array(coords, dtype=np.float32)


def _numpy_avgpool(x, kh, kw, stride):
    B, C, H, W = x.shape
    OH = (H - kh) // stride + 1
    OW = (W - kw) // stride + 1
    out = np.zeros((B, C, OH, OW), np.float32)
    for oh in range(OH):
        for ow in range(OW):
            out[:, :, oh, ow] = x[:, :, oh * stride:oh * stride + kh,
                                  ow * stride:ow * stride + kw].mean(axis=(2, 3))
    return out


if __name__ == "__main__":
    key = jax.random.PRNGKey(0)
    B, C, H, W = 2, 4, 16, 16
    x = jax.random.normal(key, (B, C, H, W), dtype=jnp.float32)

    stride = 2
    ratios = [(4, 4), (6, 6), (8, 8)]
    window_nums = [C * ((H - kh) // stride + 1) * ((W - kw) // stride + 1)
                   for (kh, kw) in ratios]                  # [196, 144, 100]
    window_nums_sum = [0] + window_nums
    N_list = [2, 2, 2]
    proposalN = sum(N_list)
    iou_threshs = [0.25, 0.25, 0.25]
    coordinates_cat = _build_coordinates(C, ratios, stride, H, W)

    idx, prop_scores, win_scores = appm_forward(
        proposalN, x, ratios, stride, window_nums_sum, N_list, iou_threshs, coordinates_cat)
    jax.block_until_ready((idx, prop_scores, win_scores))

    # Sanity check the Pallas pooling against a NumPy reference.  The kernel feeds the
    # MXU with bf16 inputs (f32 accumulation + f32 scale), so the reference is built
    # from the same bf16-rounded x and compared in f32.
    x_bf16_np = np.asarray(jnp.asarray(x, jnp.bfloat16).astype(jnp.float32))
    ref_scores = np.concatenate(
        [_numpy_avgpool(x_bf16_np, kh, kw, stride).reshape(B, -1) for (kh, kw) in ratios],
        axis=1)
    assert np.allclose(np.asarray(win_scores), ref_scores, atol=1e-4), "pooling mismatch"

    # Gathered proposal scores must equal the window scores at the chosen indices.
    gathered = np.take_along_axis(np.asarray(win_scores), np.asarray(idx), axis=1)
    assert np.allclose(np.asarray(prop_scores), gathered, atol=1e-6), "gather mismatch"

    assert idx.shape == (B, proposalN) and prop_scores.shape == (B, proposalN)
    assert win_scores.shape == (B, sum(window_nums))

    print("KERNEL_OK")
</pallas_src>

<mosaic_0001>
module attributes {stable_mosaic.version = 11 : i64} {
  func.func @_pool_kernel(%arg0: i32, %arg1: memref<8x256xbf16, #tpu.memory_space<vmem>>, %arg2: memref<256x128xbf16, #tpu.memory_space<vmem>>, %arg3: memref<1x128xf32, #tpu.memory_space<vmem>>, %arg4: memref<8x128xf32, #tpu.memory_space<vmem>>) attributes {dimension_semantics = [#tpu.dimension_semantics<parallel>], iteration_bounds = array<i64: 1>, scalar_prefetch = 0 : i64, scratch_operands = 0 : i64, tpu.core_type = #tpu.core_type<tc>, window_params = [{transform_indices = @transform_0, window_bounds = array<i64: 8, 256>}, {pipeline_mode = #tpu.pipeline_mode<synchronous>, transform_indices = @transform_1, window_bounds = array<i64: 256, 128>}, {pipeline_mode = #tpu.pipeline_mode<synchronous>, transform_indices = @transform_2, window_bounds = array<i64: 1, 128>}, {transform_indices = @transform_3, window_bounds = array<i64: 8, 128>}]} {
    %c0 = arith.constant 0 : index
    %c0_0 = arith.constant 0 : index
    %0 = vector.load %arg1[%c0, %c0_0] : memref<8x256xbf16, #tpu.memory_space<vmem>>, vector<8x256xbf16>
    %c0_1 = arith.constant 0 : index
    %c0_2 = arith.constant 0 : index
    %1 = vector.load %arg2[%c0_1, %c0_2] : memref<256x128xbf16, #tpu.memory_space<vmem>>, vector<256x128xbf16>
    %cst = arith.constant dense<0.000000e+00> : vector<8x128xf32>
    %2 = tpu.matmul %0, %1, %cst {dimension_numbers = #tpu.dot_dimension_numbers<[1], [0], [0], [1], [0, 0, 1, 1], [], []>} : vector<8x256xbf16>, vector<256x128xbf16>, vector<8x128xf32> -> vector<8x128xf32>
    %c0_3 = arith.constant 0 : index
    %c0_4 = arith.constant 0 : index
    %3 = vector.load %arg3[%c0_3, %c0_4] : memref<1x128xf32, #tpu.memory_space<vmem>>, vector<1x128xf32>
    %4 = vector.broadcast %3 : vector<1x128xf32> to vector<8x128xf32>
    %5 = arith.mulf %2, %4 : vector<8x128xf32>
    %c0_5 = arith.constant 0 : index
    %c0_6 = arith.constant 0 : index
    %6 = vector.load %arg4[%c0_5, %c0_6] : memref<8x128xf32, #tpu.memory_space<vmem>>, vector<8x128xf32>
    tpu.vector_store %arg4[%c0_5, %c0_6], %5 {strides = array<i32>} : memref<8x128xf32, #tpu.memory_space<vmem>>, vector<8x128xf32>,
    return
  }
  func.func @transform_0(%arg0: i32) -> (i32, i32) {
    %c0_i32 = arith.constant 0 : i32
    %c0_i32_0 = arith.constant 0 : i32
    return %arg0, %c0_i32 : i32, i32
  }
  func.func @transform_1(%arg0: i32) -> (i32, i32) {
    %c0_i32 = arith.constant 0 : i32
    %c0_i32_0 = arith.constant 0 : i32
    %c0_i32_1 = arith.constant 0 : i32
    return %c0_i32, %c0_i32_0 : i32, i32
  }
  func.func @transform_2(%arg0: i32) -> (i32, i32) {
    %c0_i32 = arith.constant 0 : i32
    %c0_i32_0 = arith.constant 0 : i32
    %c0_i32_1 = arith.constant 0 : i32
    return %c0_i32, %c0_i32_0 : i32, i32
  }
  func.func @transform_3(%arg0: i32) -> (i32, i32) {
    %c0_i32 = arith.constant 0 : i32
    %c0_i32_0 = arith.constant 0 : i32
    return %arg0, %c0_i32 : i32, i32
  }
}

</mosaic_0001>

<bundles_post_ra>
// kernel: tpu_custom_call.1
= control target key start
LH: loop header
LB: loop body
LE: loop exit
PB: predicated region body
PF: predicated region fallthrough
CT: control target
= control target key end

     0   :  { %8 = vsyncpa [#allocation3], 0  ;;  %s450_s0 = inlined_call_operand.hbm [shape: bf16[8,256], index: 0, kind: input, shape index: {}]   ;;  %s451_s1 = inlined_call_operand.hbm [shape: bf16[256,128], index: 1, kind: input, shape index: {}]   ;;  %s452_s2 = inlined_call_operand.vmem [shape: f32[1,128], index: 2, kind: input, shape index: {}]   ;;  %s453_s3 = inlined_call_operand.hbm [shape: f32[8,128], index: 3, kind: output, shape index: {}]  }
   0x1   :  { %9 = vsyncpa [#allocation6], 0 }
   0x2   :  { %10 = vsyncpa [#allocation4], 0  ;;  %s379_s12 = smov [#allocation2]   ;;  %s380_s14 = smov [#allocation5]  }
   0x3   :  { %s17_s13 = sshll.u32 %s379_s12, 4  ;;  %s26_s15 = sshll.u32 %s380_s14, 4  ;;  %s18_s13 = int_to_ptr.vmem [resolvable:$true] %s17_s13  ;;  %s404_s15 = int_to_ptr.vmem [resolvable:$true] %s26_s15 }
   0x4   :  { %s307_s18 = scalar_lea.hbm %s450_s0, 128 }
   0x5   :  { %p308_p0 = scmp.ne.s32.totalorder %s450_s0, %s307_s18  ;;  %p311_p1 = scmp.lt.u32.totalorder %s307_s18, %s450_s0 }
   0x7   :  { %p313_p2 = pnand %p311_p1, %p308_p0 }
   0x9   :  { %316 = shalt.err (!%p313_p2)
}
   0xa   :  { %s317_s23 = scalar_lea.vmem %s18_s13, 128  ;;  %p322_p4 = scmp.lt.s32.totalorder %s18_s13, %s18_s13 }
   0xb   :  { %p318_p3 = scmp.ne.s32.totalorder %s18_s13, %s317_s23  ;;  %p323_p5 = scmp.lt.s32.totalorder %s317_s23, %s317_s23 }
   0xd   :  { %p324_p6 = por %p323_p5, %p322_p4 }
   0xf   :  { %p325_p7 = pnand %p324_p6, %p318_p3 }
  0x11   :  { %328 = shalt.err (!%p325_p7)
}
  0x12   :  { %20 = dma.hbm_to_vmem [thread:$0]  %s450_s0, 128, %s18_s13, [#allocation3]  }
  0x13   :  { %s329_s28 = scalar_lea.hbm %s451_s1, 2048 }
  0x14   :  { %p330_p8 = scmp.ne.s32.totalorder %s451_s1, %s329_s28  ;;  %p333_p9 = scmp.lt.u32.totalorder %s329_s28, %s451_s1 }
  0x16   :  { %p335_p10 = pnand %p333_p9, %p330_p8 }
  0x18   :  { %338 = shalt.err (!%p335_p10)
}
  0x19   :  { %s339_s6 = scalar_lea.vmem %s404_s15, 2048  ;;  %p344_p12 = scmp.lt.s32.totalorder %s404_s15, %s404_s15 }
  0x1a   :  { %p340_p11 = scmp.ne.s32.totalorder %s404_s15, %s339_s6  ;;  %p345_p13 = scmp.lt.s32.totalorder %s339_s6, %s339_s6 }
  0x1c   :  { %p346_p0 = por %p345_p13, %p344_p12 }
  0x1e   :  { %p347_p1 = pnand %p346_p0, %p340_p11 }
  0x20   :  { %350 = shalt.err (!%p347_p1)
}
  0x21   :  { %s381_s0 = smov 64   ;;  %s382_s7 = smov 4  }
  0x22   :  { %32 = dma.hbm_to_vmem [thread:$0]  %s451_s1, 2048, %s404_s15, [#allocation6], %s381_s0, %s381_s0, %s382_s7  }
  0x23   :  { %373 = dma.done.wait [#allocation3], 128  }
  0x24   :  { %374 = vsyncadd [#allocation3], 4294967168 }
  0x25   :  { %375 = dma.done.wait [#allocation6], 2048  }
  0x26   :  { %376 = vsyncadd [#allocation6], 4294965248  ;;  %v289_v0 = vld [vmem:[#allocation5 + $0x40] sm:$0xff]   ;;  %v291_v2 = vld [vmem:[#allocation5 + $0x48] sm:$0xff]   ;;  %s383_s11 = smov [#allocation7]  }
  0x27   :  { %v290_v1 = vld [vmem:[#allocation5] sm:$0xff]   ;;  %262 = vmatprep.subr.bf16.mxu0 %v289_v0  ;;  %v292_v3 = vld [vmem:[#allocation5 + $0x8] sm:$0xff]   ;;  %v293_v4 = vld [vmem:[#allocation5 + $0x50] sm:$0xff]   ;;  %s233_s12 = sshll.u32 %s383_s11, 4  ;;  %s234_s12 = int_to_ptr.vmem [resolvable:$true] %s233_s12 }
  0x28   :  { %263 = vmatpush3.bf16.msra.mxu0 %v290_v1  ;;  %v294_v5 = vld [vmem:[#allocation5 + $0x10] sm:$0xff]   ;;  %v295_v6 = vld [vmem:[#allocation5 + $0x58] sm:$0xff]   ;;  %v297_v8 = vld [vmem:[#allocation5 + $0x60] sm:$0xff]   ;;  %s351_s13 = scalar_lea.vmem %s234_s12, 128  ;;  %p356_p3 = scmp.lt.s32.totalorder %s234_s12, %s234_s12 }
  0x29   :  { %264 = vmatprep.subr.bf16.mxu0 %v291_v2  ;;  %v296_v7 = vld [vmem:[#allocation5 + $0x18] sm:$0xff]   ;;  %v298_v9 = vld [vmem:[#allocation5 + $0x20] sm:$0xff]   ;;  %v299_v10 = vld [vmem:[#allocation5 + $0x68] sm:$0xff]   ;;  %p352_p2 = scmp.ne.s32.totalorder %s234_s12, %s351_s13  ;;  %p357_p4 = scmp.lt.s32.totalorder %s351_s13, %s351_s13 }
  0x2a   :  { %v42_v11 = vld [vmem:[#allocation2] sm:$0xff]  ;;  %v300_v13 = vld [vmem:[#allocation5 + $0x28] sm:$0xff]   ;;  %v301_v14 = vld [vmem:[#allocation5 + $0x70] sm:$0xff]  }
  0x2b   :  { %v244_v12 = vcombine.high %v42_v11, %v42_v11  ;;  %v302_v15 = vld [vmem:[#allocation5 + $0x30] sm:$0xff]   ;;  %v303_v16 = vld [vmem:[#allocation5 + $0x78] sm:$0xff]   ;;  %v243_v18 = vcombine.low %v42_v11, %v42_v11  ;;  %p358_p5 = por %p357_p4, %p356_p3 }
  0x2c   :  { %265 = vmatpush3.bf16.msra.mxu0 %v292_v3  ;;  %v304_v17 = vld [vmem:[#allocation5 + $0x38] sm:$0xff]  }
  0x2d   :  { %266 = vmatprep.subr.bf16.mxu0 %v293_v4  ;;  %210 = vmatprep.mubr.bf16.mxu0 %v244_v12  ;;  %v261_v21 = vld [vmem:[%s452_s2] ss:$0 sm:$0xff]  ;;  %p359_p6 = pnand %p358_p5, %p352_p2 }
  0x30   :  { %267 = vmatpush3.bf16.msra.mxu0 %v294_v5 }
  0x31   :  { %268 = vmatprep.subr.bf16.mxu0 %v295_v6 }
  0x34   :  { %269 = vmatpush3.bf16.msra.mxu0 %v296_v7 }
  0x35   :  { %270 = vmatprep.subr.bf16.mxu0 %v297_v8 }
  0x38   :  { %271 = vmatpush3.bf16.msra.mxu0 %v298_v9 }
  0x39   :  { %272 = vmatprep.subr.bf16.mxu0 %v299_v10 }
  0x3c   :  { %273 = vmatpush3.bf16.msra.mxu0 %v300_v13 }
  0x3d   :  { %274 = vmatprep.subr.bf16.mxu0 %v301_v14 }
  0x40   :  { %275 = vmatpush3.bf16.msra.mxu0 %v302_v15 }
  0x41   :  { %276 = vmatprep.subr.bf16.mxu0 %v303_v16 }
  0x44   :  { %277 = vmatpush3.bf16.msra.mxu0 %v304_v17 }
  0x47   :  { %211 = vmatmul.mubr.bf16.vlgmr.msra.gmra.mrb[0].mxu0 %v243_v18 }
 0x11a   :  { %v278_v19 = vpop.f32.mrb[0].mxu0 }
 0x11b   :  { %v279_v20 = vpop.f32.mrb[1].mxu0 }
 0x11c   :  { %v280_v22 = vadd.f32 %v279_v20, %v278_v19  ;;  %v281_v23 = vpop.f32.mrb[2].mxu0 }
 0x11d   :  { %v282_v24 = vpop.f32.mrb[3].mxu0 }
 0x11e   :  { %v225_v25 = vmul.f32 %v280_v22, %v261_v21 }
 0x120   :  { %226 = vst [vmem:[#allocation7] sm:$0xff] %v225_v25 }
 0x121   :  { %362 = shalt.err (!%p359_p6)
}
 0x122   :  { %s363_s16 = scalar_lea.hbm %s453_s3, 128 }
 0x123   :  { %p364_p7 = scmp.ne.s32.totalorder %s453_s3, %s363_s16  ;;  %p367_p8 = scmp.lt.u32.totalorder %s363_s16, %s453_s3 }
 0x125   :  { %p369_p9 = pnand %p367_p8, %p364_p7 }
 0x127   :  { %372 = shalt.err (!%p369_p9)
}
 0x128   :  { %236 = dma.vmem_to_hbm [thread:$0]  %s234_s12, 128, %s453_s3, [#allocation4]  }
 0x129   :  { %377 = dma.done.wait [#allocation4], 128  }
 0x12a   :  { %378 = vsyncadd [#allocation4], 4294967168 }
 0x12b   :  { %240 = vsyncpa [#allocation3], 1 }
 0x12c   :  { %241 = vsyncpa [#allocation6], 1 }
 0x12d   :  { %242 = vsyncpa [#allocation4], 1 }

</bundles_post_ra>
